<compile_context>
chip_gen: v5e
topology: v5e:2x2
jax: 0.10.0
libtpu: 0.0.40
codegen_flags: <defaults>
</compile_context>

<pallas_src>
import jax
import jax.numpy as jnp
from jax.experimental import pallas as pl
from jax.experimental.pallas import tpu as pltpu

_LANE = 128


def _round_up(n, m):
    return ((n + m - 1) // m) * m


def _default_block_b():
    # Generation-aware batch tile: larger on 128-MiB-VMEM parts (v5e/v6e),
    # conservative on v7x (64 MiB physical VMEM).  Best effort; falls back to
    # a size that is safe on every generation with a 32-MiB scoped limit.
    try:
        info = pltpu.get_tpu_info()
        vmem = getattr(info, "vmem_capacity_bytes", 0)
        if vmem and vmem >= 96 * 1024 * 1024:
            return 4096
    except Exception:
        pass
    return 2048


def _mlp_kernel(x_ref, w1_ref, b1_ref, w2_ref, b2_ref, w3_ref, b3_ref, o_ref):
    # Fully fused 3-layer MLP on one batch tile.  Weights are already in
    # (in, out) layout, zero-padded on hidden dims, and in the MXU compute
    # dtype.  Bias-add / ReLU stay in f32 (v5e VPU has no bf16).
    cd = w1_ref.dtype
    x = x_ref[...].astype(cd)
    h1 = jnp.dot(x, w1_ref[...], preferred_element_type=jnp.float32) + b1_ref[...]
    h1 = jnp.maximum(h1, 0.0).astype(cd)
    h2 = jnp.dot(h1, w2_ref[...], preferred_element_type=jnp.float32) + b2_ref[...]
    h2 = jnp.maximum(h2, 0.0).astype(cd)
    out = jnp.dot(h2, w3_ref[...], preferred_element_type=jnp.float32) + b3_ref[...]
    # Store only the real output lanes: no padded writeback, no external slice.
    o_ref[...] = out.astype(o_ref.dtype)


def prepare_params(params, compute_dtype=jnp.bfloat16):
    """One-time parameter prep (do NOT call per step).

    Transposes PyTorch-convention (out, in) weights to (in, out), zero-pads the
    hidden feature dims to 128-lane multiples (50->128, 200->256) so the pad
    columns stay exactly zero and the math is unchanged, and casts weights to
    the MXU compute dtype.  fc3's output dim is NOT padded.  Biases stay f32.
    """
    def prep(w, b, pad_in, pad_out):
        out_f, in_f = w.shape
        out_p = _round_up(out_f, _LANE) if pad_out else out_f
        in_p = _round_up(in_f, _LANE) if pad_in else in_f
        wt = jnp.zeros((in_p, out_p), jnp.float32)
        wt = wt.at[:in_f, :out_f].set(w.T.astype(jnp.float32))
        bp = jnp.zeros((1, out_p), jnp.float32).at[0, :out_f].set(
            b.astype(jnp.float32))
        return wt.astype(compute_dtype), bp

    w1, b1 = prep(params["fc1_w"], params["fc1_b"], pad_in=False, pad_out=True)
    w2, b2 = prep(params["fc2_w"], params["fc2_b"], pad_in=True, pad_out=True)
    w3, b3 = prep(params["fc3_w"], params["fc3_b"], pad_in=True, pad_out=False)
    return {
        "w1": w1, "b1": b1, "w2": w2, "b2": b2, "w3": w3, "b3": b3,
        "n_output": int(params["fc3_w"].shape[0]),
    }


def net_forward(x, prepped, block_b=None):
    """Fused MLP forward. x: (B, n_input) f32/bf16. Returns (B, n_output) f32."""
    B, n_in = x.shape
    w1, b1 = prepped["w1"], prepped["b1"]
    w2, b2 = prepped["w2"], prepped["b2"]
    w3, b3 = prepped["w3"], prepped["b3"]
    n_out = prepped["n_output"]

    if block_b is None:
        block_b = _default_block_b()

    # Batch tile: multiple of 8, never larger than block_b, and split so that
    # grid >= 2 whenever B is nontrivial (keeps both v7x TensorCores busy).
    tb = min(block_b, max(8, _round_up(-(-B // 2), 8)))
    grid = (pl.cdiv(B, tb),)

    full2d = lambda a: pl.BlockSpec(a.shape, lambda i: (0, 0))

    flops = 2 * B * (n_in * w1.shape[1] + w2.shape[0] * w2.shape[1]
                     + w3.shape[0] * w3.shape[1])
    bytes_accessed = (x.size * x.dtype.itemsize
                      + sum(a.size * a.dtype.itemsize
                            for a in (w1, b1, w2, b2, w3, b3))
                      + B * n_out * 4)

    out = pl.pallas_call(
        _mlp_kernel,
        out_shape=jax.ShapeDtypeStruct((B, n_out), jnp.float32),
        grid=grid,
        in_specs=[
            pl.BlockSpec((tb, n_in), lambda i: (i, 0)),   # x: batch-tiled, streamed
            full2d(w1), full2d(b1),                        # weights: VMEM-resident
            full2d(w2), full2d(b2),                        # (constant index_map ->
            full2d(w3), full2d(b3),                        #  DMA'd once per call)
        ],
        out_specs=pl.BlockSpec((tb, n_out), lambda i: (i, 0)),
        compiler_params=pltpu.CompilerParams(
            dimension_semantics=("parallel",),
            vmem_limit_bytes=32 * 1024 * 1024),
        cost_estimate=pl.CostEstimate(
            flops=flops, transcendentals=0, bytes_accessed=bytes_accessed),
    )(x, w1, b1, w2, b2, w3, b3)
    return out


def init_params(key, n_input, n_output):
    """Deterministic init matching nn.Linear shapes: weight (out, in), bias (out,)."""
    ks = jax.random.split(key, 6)

    def lin(kw, kb, fan_in, fan_out):
        bound = 1.0 / jnp.sqrt(fan_in)
        w = jax.random.uniform(kw, (fan_out, fan_in), jnp.float32, -bound, bound)
        b = jax.random.uniform(kb, (fan_out,), jnp.float32, -bound, bound)
        return w, b

    w1, b1 = lin(ks[0], ks[1], n_input, 50)
    w2, b2 = lin(ks[2], ks[3], 50, 200)
    w3, b3 = lin(ks[4], ks[5], 200, n_output)
    return {"fc1_w": w1, "fc1_b": b1,
            "fc2_w": w2, "fc2_b": b2,
            "fc3_w": w3, "fc3_b": b3}


def reference_forward(x, p):
    dot = lambda a, b: jnp.dot(a, b, precision=jax.lax.Precision.HIGHEST)
    h1 = jnp.maximum(dot(x, p["fc1_w"].T) + p["fc1_b"], 0.0)
    h2 = jnp.maximum(dot(h1, p["fc2_w"].T) + p["fc2_b"], 0.0)
    return dot(h2, p["fc3_w"].T) + p["fc3_b"]


if __name__ == "__main__":
    n_input, n_output = 16, 8

    key = jax.random.PRNGKey(0)
    kx, kx2, kp = jax.random.split(key, 3)
    params = init_params(kp, n_input, n_output)

    prepped_f32 = prepare_params(params, compute_dtype=jnp.float32)
    prepped_bf16 = prepare_params(params, compute_dtype=jnp.bfloat16)

    # Small batch (single tile): tight f32 check + bf16-MXU check.
    x_small = jax.random.normal(kx, (8, n_input), jnp.float32)
    ref_small = reference_forward(x_small, params)

    out_f32 = jax.block_until_ready(net_forward(x_small, prepped_f32))
    assert out_f32.shape == (8, n_output)
    assert jnp.allclose(out_f32, ref_small, atol=1e-4, rtol=1e-4)

    out_bf16 = jax.block_until_ready(net_forward(x_small, prepped_bf16))
    assert out_bf16.shape == (8, n_output)
    assert jnp.allclose(out_bf16, ref_small, atol=5e-2, rtol=5e-2)

    # Larger batch: exercises grid >= 2 (both v7x cores) and a partial last tile.
    x_big = jax.random.normal(kx2, (600, n_input), jnp.float32)
    ref_big = reference_forward(x_big, params)
    out_big = jax.block_until_ready(net_forward(x_big, prepped_f32))
    assert out_big.shape == (600, n_output)
    assert jnp.allclose(out_big, ref_big, atol=1e-4, rtol=1e-4)

    print("KERNEL_OK")
</pallas_src>

<mosaic_0001>
module attributes {stable_mosaic.version = 11 : i64} {
  func.func @_mlp_kernel(%arg0: i32, %arg1: memref<8x16xf32, #tpu.memory_space<vmem>>, %arg2: memref<16x128xf32, #tpu.memory_space<vmem>>, %arg3: memref<1x128xf32, #tpu.memory_space<vmem>>, %arg4: memref<128x256xf32, #tpu.memory_space<vmem>>, %arg5: memref<1x256xf32, #tpu.memory_space<vmem>>, %arg6: memref<256x8xf32, #tpu.memory_space<vmem>>, %arg7: memref<1x8xf32, #tpu.memory_space<vmem>>, %arg8: memref<8x8xf32, #tpu.memory_space<vmem>>) attributes {dimension_semantics = [#tpu.dimension_semantics<parallel>], iteration_bounds = array<i64: 1>, scalar_prefetch = 0 : i64, scratch_operands = 0 : i64, tpu.core_type = #tpu.core_type<tc>, window_params = [{transform_indices = @transform_0, window_bounds = array<i64: 8, 16>}, {pipeline_mode = #tpu.pipeline_mode<synchronous>, transform_indices = @transform_1, window_bounds = array<i64: 16, 128>}, {pipeline_mode = #tpu.pipeline_mode<synchronous>, transform_indices = @transform_2, window_bounds = array<i64: 1, 128>}, {pipeline_mode = #tpu.pipeline_mode<synchronous>, transform_indices = @transform_3, window_bounds = array<i64: 128, 256>}, {pipeline_mode = #tpu.pipeline_mode<synchronous>, transform_indices = @transform_4, window_bounds = array<i64: 1, 256>}, {pipeline_mode = #tpu.pipeline_mode<synchronous>, transform_indices = @transform_5, window_bounds = array<i64: 256, 8>}, {pipeline_mode = #tpu.pipeline_mode<synchronous>, transform_indices = @transform_6, window_bounds = array<i64: 1, 8>}, {transform_indices = @transform_7, window_bounds = array<i64: 8, 8>}]} {
    %c0 = arith.constant 0 : index
    %c0_0 = arith.constant 0 : index
    %0 = vector.load %arg1[%c0, %c0_0] : memref<8x16xf32, #tpu.memory_space<vmem>>, vector<8x16xf32>
    %c0_1 = arith.constant 0 : index
    %c0_2 = arith.constant 0 : index
    %1 = vector.load %arg2[%c0_1, %c0_2] : memref<16x128xf32, #tpu.memory_space<vmem>>, vector<16x128xf32>
    %cst = arith.constant dense<0.000000e+00> : vector<8x128xf32>
    %2 = tpu.matmul %0, %1, %cst {dimension_numbers = #tpu.dot_dimension_numbers<[1], [0], [0], [1], [0, 0, 1, 1], [], []>} : vector<8x16xf32>, vector<16x128xf32>, vector<8x128xf32> -> vector<8x128xf32>
    %c0_3 = arith.constant 0 : index
    %c0_4 = arith.constant 0 : index
    %3 = vector.load %arg3[%c0_3, %c0_4] : memref<1x128xf32, #tpu.memory_space<vmem>>, vector<1x128xf32>
    %4 = vector.broadcast %3 : vector<1x128xf32> to vector<8x128xf32>
    %5 = arith.addf %2, %4 : vector<8x128xf32>
    %cst_5 = arith.constant 0.000000e+00 : f32
    %6 = vector.broadcast %cst_5 : f32 to vector<8x128xf32>
    %7 = arith.maximumf %5, %6 : vector<8x128xf32>
    %c0_6 = arith.constant 0 : index
    %c0_7 = arith.constant 0 : index
    %8 = vector.load %arg4[%c0_6, %c0_7] : memref<128x256xf32, #tpu.memory_space<vmem>>, vector<128x256xf32>
    %cst_8 = arith.constant dense<0.000000e+00> : vector<8x256xf32>
    %9 = tpu.matmul %7, %8, %cst_8 {dimension_numbers = #tpu.dot_dimension_numbers<[1], [0], [0], [1], [0, 0, 1, 1], [], []>} : vector<8x128xf32>, vector<128x256xf32>, vector<8x256xf32> -> vector<8x256xf32>
    %c0_9 = arith.constant 0 : index
    %c0_10 = arith.constant 0 : index
    %10 = vector.load %arg5[%c0_9, %c0_10] : memref<1x256xf32, #tpu.memory_space<vmem>>, vector<1x256xf32>
    %11 = vector.broadcast %10 : vector<1x256xf32> to vector<8x256xf32>
    %12 = arith.addf %9, %11 : vector<8x256xf32>
    %cst_11 = arith.constant 0.000000e+00 : f32
    %13 = vector.broadcast %cst_11 : f32 to vector<8x256xf32>
    %14 = arith.maximumf %12, %13 : vector<8x256xf32>
    %c0_12 = arith.constant 0 : index
    %c0_13 = arith.constant 0 : index
    %15 = vector.load %arg6[%c0_12, %c0_13] : memref<256x8xf32, #tpu.memory_space<vmem>>, vector<256x8xf32>
    %cst_14 = arith.constant dense<0.000000e+00> : vector<8x8xf32>
    %16 = tpu.matmul %14, %15, %cst_14 {dimension_numbers = #tpu.dot_dimension_numbers<[1], [0], [0], [1], [0, 0, 1, 1], [], []>} : vector<8x256xf32>, vector<256x8xf32>, vector<8x8xf32> -> vector<8x8xf32>
    %c0_15 = arith.constant 0 : index
    %c0_16 = arith.constant 0 : index
    %17 = vector.load %arg7[%c0_15, %c0_16] : memref<1x8xf32, #tpu.memory_space<vmem>>, vector<1x8xf32>
    %18 = vector.broadcast %17 : vector<1x8xf32> to vector<8x8xf32>
    %19 = arith.addf %16, %18 : vector<8x8xf32>
    %c0_17 = arith.constant 0 : index
    %c0_18 = arith.constant 0 : index
    %20 = vector.load %arg8[%c0_17, %c0_18] : memref<8x8xf32, #tpu.memory_space<vmem>>, vector<8x8xf32>
    tpu.vector_store %arg8[%c0_17, %c0_18], %19 {strides = array<i32>} : memref<8x8xf32, #tpu.memory_space<vmem>>, vector<8x8xf32>,
    return
  }
  func.func @transform_0(%arg0: i32) -> (i32, i32) {
    %c0_i32 = arith.constant 0 : i32
    %c0_i32_0 = arith.constant 0 : i32
    return %arg0, %c0_i32 : i32, i32
  }
  func.func @transform_1(%arg0: i32) -> (i32, i32) {
    %c0_i32 = arith.constant 0 : i32
    %c0_i32_0 = arith.constant 0 : i32
    %c0_i32_1 = arith.constant 0 : i32
    return %c0_i32, %c0_i32_0 : i32, i32
  }
  func.func @transform_2(%arg0: i32) -> (i32, i32) {
    %c0_i32 = arith.constant 0 : i32
    %c0_i32_0 = arith.constant 0 : i32
    %c0_i32_1 = arith.constant 0 : i32
    return %c0_i32, %c0_i32_0 : i32, i32
  }
  func.func @transform_3(%arg0: i32) -> (i32, i32) {
    %c0_i32 = arith.constant 0 : i32
    %c0_i32_0 = arith.constant 0 : i32
    %c0_i32_1 = arith.constant 0 : i32
    return %c0_i32, %c0_i32_0 : i32, i32
  }
  func.func @transform_4(%arg0: i32) -> (i32, i32) {
    %c0_i32 = arith.constant 0 : i32
    %c0_i32_0 = arith.constant 0 : i32
    %c0_i32_1 = arith.constant 0 : i32
    return %c0_i32, %c0_i32_0 : i32, i32
  }
  func.func @transform_5(%arg0: i32) -> (i32, i32) {
    %c0_i32 = arith.constant 0 : i32
    %c0_i32_0 = arith.constant 0 : i32
    %c0_i32_1 = arith.constant 0 : i32
    return %c0_i32, %c0_i32_0 : i32, i32
  }
  func.func @transform_6(%arg0: i32) -> (i32, i32) {
    %c0_i32 = arith.constant 0 : i32
    %c0_i32_0 = arith.constant 0 : i32
    %c0_i32_1 = arith.constant 0 : i32
    return %c0_i32, %c0_i32_0 : i32, i32
  }
  func.func @transform_7(%arg0: i32) -> (i32, i32) {
    %c0_i32 = arith.constant 0 : i32
    %c0_i32_0 = arith.constant 0 : i32
    return %arg0, %c0_i32 : i32, i32
  }
}

</mosaic_0001>

<bundles_post_ra>
// kernel: tpu_custom_call.1
= control target key start
LH: loop header
LB: loop body
LE: loop exit
PB: predicated region body
PF: predicated region fallthrough
CT: control target
= control target key end

     0   :  { %12 = vsyncpa [#allocation3], 0  ;;  %s603_s0 = inlined_call_operand.hbm [shape: f32[8,16], index: 0, kind: input, shape index: {}]   ;;  %s604_s1 = inlined_call_operand.vmem [shape: f32[16,128], index: 1, kind: input, shape index: {}]   ;;  %s605_s2 = inlined_call_operand.hbm [shape: f32[1,128], index: 2, kind: input, shape index: {}]   ;;  %s606_s3 = inlined_call_operand.vmem [shape: f32[128,256], index: 3, kind: input, shape index: {}]   ;;  %s607_s4 = inlined_call_operand.vmem [shape: f32[1,256], index: 4, kind: input, shape index: {}]   ;;  %s608_s5 = inlined_call_operand.vmem [shape: f32[256,8], index: 5, kind: input, shape index: {}]   ;;  %s609_s6 = inlined_call_operand.vmem [shape: f32[1,8], index: 6, kind: input, shape index: {}]   ;;  %s610_s7 = inlined_call_operand.hbm [shape: f32[8,8], index: 7, kind: output, shape index: {}]  }
   0x1   :  { %13 = vsyncpa [#allocation6], 0 }
   0x2   :  { %14 = vsyncpa [#allocation4], 0  ;;  %s20_s26 = sshll.u32 %s603_s0, 4  ;;  %s347_s27 = smov [#allocation2]   ;;  %s21_s26 = int_to_ptr.hbm [resolvable:$true] %s20_s26 }
   0x3   :  { %s22_s28 = sshll.u32 %s347_s27, 4  ;;  %s33_s8 = sshll.u32 %s605_s2, 4  ;;  %s23_s28 = int_to_ptr.vmem [resolvable:$true] %s22_s28  ;;  %s34_s8 = int_to_ptr.hbm [resolvable:$true] %s33_s8 }
   0x4   :  { %25 = dma.hbm_to_vmem [thread:$0]  %s21_s26, 128, %s23_s28, [#allocation3]  }
   0x5   :  { %s348_s9 = smov [#allocation5]  }
   0x6   :  { %s35_s10 = sshll.u32 %s348_s9, 4  ;;  %s36_s10 = int_to_ptr.vmem [resolvable:$true] %s35_s10 }
   0x7   :  { %38 = dma.hbm_to_vmem [thread:$0]  %s34_s8, 16, %s36_s10, [#allocation6]  }
   0x8   :  { %341 = dma.done.wait [#allocation3], 128  }
   0x9   :  { %342 = vsyncadd [#allocation3], 4294967168 }
   0xa   :  { %343 = dma.done.wait [#allocation6], 16  }
   0xb   :  { %344 = vsyncadd [#allocation6], 4294967280  ;;  %v57_v0 = vld [vmem:[%s604_s1 + $0x8] sm:$0xff]  ;;  %v56_v1 = vld [vmem:[%s604_s1] sm:$0xff]  ;;  %vm62_vm0 = vcmask 130048   ;;  %vm243_vm1 = vcmask 64512  }
   0xc   :  { %v55_v2 = vld [vmem:[#allocation2] sm:$0xff]  ;;  %80 = vmatpush.msra.mxu0 %v57_v0  ;;  %v117_v3 = vld [vmem:[%s606_s3 + $0xf0] sm:$0xff]  ;;  %v118_v4 = vld [vmem:[%s606_s3 + $0xf8] sm:$0xff] }
   0xd   :  { %v115_v5 = vld [vmem:[%s606_s3 + $0xe0] sm:$0xff]  ;;  %125 = vmatpush.msra.mxu1 %v117_v3  ;;  %145 = vmatpush.msra.mxu2 %v118_v4  ;;  %v116_v6 = vld [vmem:[%s606_s3 + $0xe8] sm:$0xff]  ;;  %v113_v7 = vld [vmem:[%s606_s3 + $0xd0] sm:$0xff] }
   0xe   :  { %81 = vmatpush.msra.mxu0 %v56_v1  ;;  %v114_v8 = vld [vmem:[%s606_s3 + $0xd8] sm:$0xff]  ;;  %v111_v9 = vld [vmem:[%s606_s3 + $0xc0] sm:$0xff]  ;;  %v112_v10 = vld [vmem:[%s606_s3 + $0xc8] sm:$0xff] }
   0xf   :  { %263 = vmatmul.msk.f32.vlgmr.msra.gmra.mxu0 %vm62_vm0, %v55_v2  ;;  %126 = vmatpush.msra.mxu1 %v115_v5  ;;  %v109_v11 = vld [vmem:[%s606_s3 + $0xb0] sm:$0xff]  ;;  %v110_v12 = vld [vmem:[%s606_s3 + $0xb8] sm:$0xff]  ;;  %v107_v13 = vld [vmem:[%s606_s3 + $0xa0] sm:$0xff] }
  0x10   :  { %146 = vmatpush.msra.mxu2 %v116_v6  ;;  %v108_v14 = vld [vmem:[%s606_s3 + $0xa8] sm:$0xff]  ;;  %v105_v15 = vld [vmem:[%s606_s3 + $0x90] sm:$0xff]  ;;  %v106_v16 = vld [vmem:[%s606_s3 + $0x98] sm:$0xff] }
  0x11   :  { %127 = vmatpush.msra.mxu1 %v113_v7  ;;  %v103_v17 = vld [vmem:[%s606_s3 + $0x80] sm:$0xff]  ;;  %v104_v18 = vld [vmem:[%s606_s3 + $0x88] sm:$0xff]  ;;  %v101_v19 = vld [vmem:[%s606_s3 + $0x70] sm:$0xff] }
  0x12   :  { %147 = vmatpush.msra.mxu2 %v114_v8  ;;  %v102_v20 = vld [vmem:[%s606_s3 + $0x78] sm:$0xff]  ;;  %v99_v21 = vld [vmem:[%s606_s3 + $0x60] sm:$0xff]  ;;  %v100_v22 = vld [vmem:[%s606_s3 + $0x68] sm:$0xff] }
  0x13   :  { %128 = vmatpush.msra.mxu1 %v111_v9  ;;  %v97_v23 = vld [vmem:[%s606_s3 + $0x50] sm:$0xff]  ;;  %v98_v24 = vld [vmem:[%s606_s3 + $0x58] sm:$0xff]  ;;  %v95_v25 = vld [vmem:[%s606_s3 + $0x40] sm:$0xff] }
  0x14   :  { %148 = vmatpush.msra.mxu2 %v112_v10  ;;  %v96_v26 = vld [vmem:[%s606_s3 + $0x48] sm:$0xff]  ;;  %v93_v27 = vld [vmem:[%s606_s3 + $0x30] sm:$0xff]  ;;  %v94_v28 = vld [vmem:[%s606_s3 + $0x38] sm:$0xff] }
  0x15   :  { %129 = vmatpush.msra.mxu1 %v109_v11  ;;  %v91_v29 = vld [vmem:[%s606_s3 + $0x20] sm:$0xff]  ;;  %v92_v30 = vld [vmem:[%s606_s3 + $0x28] sm:$0xff]  ;;  %v89_v31 = vld [vmem:[%s606_s3 + $0x10] sm:$0xff] }
  0x16   :  { %149 = vmatpush.msra.mxu2 %v110_v12  ;;  %v90_v32 = vld [vmem:[%s606_s3 + $0x18] sm:$0xff]  ;;  %v87_v33 = vld [vmem:[%s606_s3] sm:$0xff]  ;;  %v88_v34 = vld [vmem:[%s606_s3 + $0x8] sm:$0xff] }
  0x17   :  { %130 = vmatpush.msra.mxu1 %v107_v13  ;;  %v182_v35 = vld [vmem:[%s608_s5 + $0x78] sm:$0xff]  ;;  %v181_v36 = vld [vmem:[%s608_s5 + $0x70] sm:$0xff]  ;;  %v180_v38 = vld [vmem:[%s608_s5 + $0x68] sm:$0xff] }
  0x18   :  { %150 = vmatpush.msra.mxu2 %v108_v14  ;;  %203 = vmatpush.msra.mxu3 %v182_v35  ;;  %v198_v37 = vld [vmem:[%s608_s5 + $0xf8] sm:$0xff]  ;;  %v197_v39 = vld [vmem:[%s608_s5 + $0xf0] sm:$0xff]  ;;  %v196_v40 = vld [vmem:[%s608_s5 + $0xe8] sm:$0xff] }
  0x19   :  { %131 = vmatpush.msra.mxu1 %v105_v15  ;;  %223 = vmatpush.msrb.mxu0 %v198_v37  ;;  %v179_v41 = vld [vmem:[%s608_s5 + $0x60] sm:$0xff]  ;;  %v178_v43 = vld [vmem:[%s608_s5 + $0x58] sm:$0xff]  ;;  %v177_v45 = vld [vmem:[%s608_s5 + $0x50] sm:$0xff] }
  0x1a   :  { %151 = vmatpush.msra.mxu2 %v106_v16  ;;  %204 = vmatpush.msra.mxu3 %v181_v36  ;;  %v195_v42 = vld [vmem:[%s608_s5 + $0xe0] sm:$0xff]  ;;  %v194_v44 = vld [vmem:[%s608_s5 + $0xd8] sm:$0xff]  ;;  %v193_v46 = vld [vmem:[%s608_s5 + $0xd0] sm:$0xff] }
  0x1b   :  { %132 = vmatpush.msra.mxu1 %v103_v17  ;;  %224 = vmatpush.msrb.mxu0 %v197_v39  ;;  %v176_v47 = vld [vmem:[%s608_s5 + $0x48] sm:$0xff]  ;;  %v175_v49 = vld [vmem:[%s608_s5 + $0x40] sm:$0xff]  ;;  %v174_v51 = vld [vmem:[%s608_s5 + $0x38] sm:$0xff] }
  0x1c   :  { %152 = vmatpush.msra.mxu2 %v104_v18  ;;  %205 = vmatpush.msra.mxu3 %v180_v38  ;;  %v192_v48 = vld [vmem:[%s608_s5 + $0xc8] sm:$0xff]  ;;  %v191_v50 = vld [vmem:[%s608_s5 + $0xc0] sm:$0xff]  ;;  %v190_v52 = vld [vmem:[%s608_s5 + $0xb8] sm:$0xff] }
  0x1d   :  { %133 = vmatpush.msra.mxu1 %v101_v19  ;;  %225 = vmatpush.msrb.mxu0 %v196_v40  ;;  %v173_v53 = vld [vmem:[%s608_s5 + $0x30] sm:$0xff]  ;;  %v172_v55 = vld [vmem:[%s608_s5 + $0x28] sm:$0xff]  ;;  %v171_v56 = vld [vmem:[%s608_s5 + $0x20] sm:$0xff] }
  0x1e   :  { %153 = vmatpush.msra.mxu2 %v102_v20  ;;  %206 = vmatpush.msra.mxu3 %v179_v41  ;;  %v189_v54 = vld [vmem:[%s608_s5 + $0xb0] sm:$0xff]  ;;  %v170_v57 = vld [vmem:[%s608_s5 + $0x18] sm:$0xff]  ;;  %v267_v58 = vld [vmem:[#allocation5] ss:$0 sm:$0xff] }
  0x1f   :  { %134 = vmatpush.msra.mxu1 %v99_v21  ;;  %226 = vmatpush.msrb.mxu0 %v195_v42  ;;  %v169_v62 = vld [vmem:[%s608_s5 + $0x10] sm:$0xff]  ;;  %v188_v63 = vld [vmem:[%s608_s5 + $0xa8] sm:$0xff]  ;;  %v187_v1 = vld [vmem:[%s608_s5 + $0xa0] sm:$0xff] }
  0x20   :  { %154 = vmatpush.msra.mxu2 %v100_v22  ;;  %207 = vmatpush.msra.mxu3 %v178_v43  ;;  %v168_v0 = vld [vmem:[%s608_s5 + $0x8] sm:$0xff]  ;;  %v167_v2 = vld [vmem:[%s608_s5] sm:$0xff]  ;;  %v186_v3 = vld [vmem:[%s608_s5 + $0x98] sm:$0xff] }
  0x21   :  { %135 = vmatpush.msra.mxu1 %v97_v23  ;;  %227 = vmatpush.msrb.mxu0 %v194_v44  ;;  %v185_v4 = vld [vmem:[%s608_s5 + $0x90] sm:$0xff]  ;;  %v184_v5 = vld [vmem:[%s608_s5 + $0x88] sm:$0xff]  ;;  %v183_v6 = vld [vmem:[%s608_s5 + $0x80] sm:$0xff]  ;;  %s349_s5 = smov [#allocation7]  }
  0x22   :  { %155 = vmatpush.msra.mxu2 %v98_v24  ;;  %208 = vmatpush.msra.mxu3 %v177_v45  ;;  %v119_v7 = vld [vmem:[%s607_s4] sm:$0x3]  ;;  %s250_s13 = sshll.u32 %s349_s5, 4  ;;  %s252_s4 = sshll.u32 %s610_s7, 4  ;;  %s251_s13 = int_to_ptr.vmem [resolvable:$true] %s250_s13  ;;  %s253_s4 = int_to_ptr.hbm [resolvable:$true] %s252_s4 }
  0x23   :  { %136 = vmatpush.msra.mxu1 %v95_v25  ;;  %228 = vmatpush.msrb.mxu0 %v193_v46  ;;  %v121_v8 = vperm.slane %v119_v7, 0  ;;  %v122_v12 = vperm.slane %v119_v7, 1  ;;  %v268_v16 = vld [vmem:[%s609_s6] ss:$0 sm:$0xff] }
  0x24   :  { %156 = vmatpush.msra.mxu2 %v96_v26  ;;  %209 = vmatpush.msra.mxu3 %v176_v47 }
  0x25   :  { %137 = vmatpush.msra.mxu1 %v93_v27  ;;  %229 = vmatpush.msrb.mxu0 %v192_v48 }
  0x26   :  { %157 = vmatpush.msra.mxu2 %v94_v28  ;;  %210 = vmatpush.msra.mxu3 %v175_v49 }
  0x27   :  { %138 = vmatpush.msra.mxu1 %v91_v29  ;;  %230 = vmatpush.msrb.mxu0 %v191_v50 }
  0x28   :  { %158 = vmatpush.msra.mxu2 %v92_v30  ;;  %211 = vmatpush.msra.mxu3 %v174_v51 }
  0x29   :  { %139 = vmatpush.msra.mxu1 %v89_v31  ;;  %231 = vmatpush.msrb.mxu0 %v190_v52 }
  0x2a   :  { %159 = vmatpush.msra.mxu2 %v90_v32  ;;  %212 = vmatpush.msra.mxu3 %v173_v53 }
  0x2b   :  { %140 = vmatpush.msra.mxu1 %v87_v33  ;;  %232 = vmatpush.msrb.mxu0 %v189_v54 }
  0x2c   :  { %160 = vmatpush.msra.mxu2 %v88_v34  ;;  %213 = vmatpush.msra.mxu3 %v172_v55 }
  0x2d   :  { %233 = vmatpush.msrb.mxu0 %v188_v63 }
  0x2e   :  { %214 = vmatpush.msra.mxu3 %v171_v56 }
  0x2f   :  { %234 = vmatpush.msrb.mxu0 %v187_v1 }
  0x30   :  { %215 = vmatpush.msra.mxu3 %v170_v57 }
  0x31   :  { %235 = vmatpush.msrb.mxu0 %v186_v3 }
  0x32   :  { %216 = vmatpush.msra.mxu3 %v169_v62 }
  0x33   :  { %236 = vmatpush.msrb.mxu0 %v185_v4 }
  0x34   :  { %217 = vmatpush.msra.mxu3 %v168_v0 }
  0x35   :  { %237 = vmatpush.msrb.mxu0 %v184_v5 }
  0x36   :  { %218 = vmatpush.msra.mxu3 %v167_v2 }
  0x37   :  { %238 = vmatpush.msrb.mxu0 %v183_v6 }
  0x8c   :  { %v83_v59 = vpop.f32.mrf.mxu0 }
  0x8d   :  { %v84_v60 = vadd.f32 %v267_v58, %v83_v59 }
  0x8f   :  { %v86_v61 = vmax.f32 %v84_v60, 0.0 }
  0x91   :  { %141 = vmatmul.f32.vlgmr.msra.gmra.mxu1 %v86_v61  ;;  %161 = vmatmul.f32.vlgmr.msra.gmra.mxu2 %v86_v61 }
 0x10e   :  { %v142_v9 = vpop.f32.mrf.mxu1 }
 0x10f   :  { %v143_v10 = vadd.f32 %v142_v9, %v121_v8 }
 0x111   :  { %v165_v11 = vmax.f32 %v143_v10, 0.0 }
 0x113   :  { %219 = vmatmul.f32.vlgmr.msra.gmra.mxu3 %v165_v11 }
 0x114   :  { %v162_v13 = vpop.f32.mrf.mxu2 }
 0x115   :  { %v163_v14 = vadd.f32 %v162_v13, %v122_v12 }
 0x117   :  { %v166_v15 = vmax.f32 %v163_v14, 0.0 }
 0x119   :  { %239 = vmatmul.f32.vlgmr.msrb.gmra.mxu0 %v166_v15 }
 0x196   :  { %v220_v17 = vpop.f32.mrf.mxu3  ;;  %v240_v19 = vpop.f32.mrf.mxu0 }
 0x197   :  { %v221_v18 = vadd.f32 %v268_v16, %v220_v17 }
 0x199   :  { %v241_v20 = vadd.f32 %v240_v19, %v221_v18 }
 0x19b   :  { %244 = vst.msk [vmem:[#allocation7] sm:$0xff] %vm243_vm1, %v241_v20 }
 0x19c   :  { %255 = dma.vmem_to_hbm [thread:$0]  %s251_s13, 128, %s253_s4, [#allocation4]  }
 0x19d   :  { %345 = dma.done.wait [#allocation4], 128  }
 0x19e   :  { %346 = vsyncadd [#allocation4], 4294967168 }
 0x19f   :  { %260 = vsyncpa [#allocation3], 1 }
 0x1a0   :  { %261 = vsyncpa [#allocation6], 1 }
 0x1a1   :  { %262 = vsyncpa [#allocation4], 1 }

</bundles_post_ra>
